<compile_context>
chip_gen: v7x
topology: tpu7x:2x2x1
jax: 0.10.0
libtpu: 0.0.40
codegen_flags: <defaults>
</compile_context>

<pallas_src>
import functools

import jax
import jax.numpy as jnp
from jax.experimental import pallas as pl
from jax.experimental.pallas import tpu as pltpu


def _patch_embed_kernel(p_ref, w_ref, b_ref, o_ref):
    # p_ref: (tm, K) bf16   -- streamed / pipelined over the grid
    # w_ref: (K, N)  bf16   -- resident (constant index_map)
    # b_ref: (1, N)  f32    -- resident
    # o_ref: (tm, N) out_dtype (default bf16) -- lane-dense output block
    acc = jnp.dot(p_ref[...], w_ref[...], preferred_element_type=jnp.float32)
    o_ref[...] = (acc + b_ref[...]).astype(o_ref.dtype)


def prepare_patch_embed_params(conv_weight, conv_bias):
    """One-time weight repack (hoisted out of the per-call hot path).

    conv_weight: (E, 1, ph, pw)  PyTorch Conv2d weight layout
    conv_bias:   (E,)
    Returns:
      w_kwkh: (pw*ph, E) bf16, K flattened in (kw, kh) order
      b_row : (1, E)     f32
    """
    E, _, ph, pw = conv_weight.shape
    # w_kwkh[kw*ph + kh, e] = conv_weight[e, 0, kh, kw]
    w_kwkh = jnp.transpose(conv_weight[:, 0, :, :], (2, 1, 0)).reshape(pw * ph, E)
    return w_kwkh.astype(jnp.bfloat16), conv_bias.reshape(1, E).astype(jnp.float32)


def _pick_tm(m):
    """Fixed M-tile: multiple of 16 (bf16 sublane packing), capped at 1024,
    aimed at >= 8 grid steps on large problems.  No divisibility requirement:
    the grid uses cdiv and Pallas masks the partial last block."""
    tm = (m // 8) // 16 * 16          # target ~8+ steps on big M
    return max(16, min(1024, tm))


@functools.partial(jax.jit, static_argnames=("patch_size", "out_dtype"))
def patch_embed_forward(x, w_kwkh, b_row, *, patch_size, out_dtype=jnp.bfloat16):
    """
    x:       (B, T, F) float32
    w_kwkh:  (pw*ph, E) bf16  -- from prepare_patch_embed_params
    b_row:   (1, E) float32
    returns: (B, num_patches, E) out_dtype, num_patches = (F//ph)*(T//pw)
    """
    B, T, F = x.shape
    ph, pw = patch_size
    K, E = w_kwkh.shape
    Fp, Tp = F // ph, T // pw
    num_patches = Fp * Tp
    M = B * num_patches

    # Conv2d with stride == kernel silently drops the remainder; do it explicitly.
    if (T % pw) or (F % ph):
        x = x[:, : Tp * pw, : Fp * ph]

    # --- single fused extraction pass (one transpose-copy, bf16 cast fused) ---
    # patches[(b, fp, tp), kw*ph + kh] = x[b, tp*pw + kw, fp*ph + kh]
    patches = (
        x.reshape(B, Tp, pw, Fp, ph)       # free reshape (contiguous split)
        .transpose(0, 3, 1, 2, 4)          # (B, Fp, Tp, pw, ph) -- the one copy
        .reshape(M, K)
        .astype(jnp.bfloat16)              # fused into the same copy under jit
    )

    tm = _pick_tm(M)
    grid_m = pl.cdiv(M, tm)                # partial last block is masked by Pallas

    out_bytes = jnp.dtype(out_dtype).itemsize
    cost = pl.CostEstimate(
        flops=2 * M * K * E,
        transcendentals=0,
        bytes_accessed=M * K * 2 + K * E * 2 + E * 4 + M * E * out_bytes,
    )

    out = pl.pallas_call(
        _patch_embed_kernel,
        out_shape=jax.ShapeDtypeStruct((M, E), out_dtype),
        grid_spec=pltpu.PrefetchScalarGridSpec(
            num_scalar_prefetch=0,
            grid=(grid_m,),
            in_specs=[
                pl.BlockSpec((tm, K), lambda i: (i, 0)),   # patches: pipelined
                pl.BlockSpec((K, E), lambda i: (0, 0)),    # weight: resident
                pl.BlockSpec((1, E), lambda i: (0, 0)),    # bias: resident
            ],
            out_specs=pl.BlockSpec((tm, E), lambda i: (i, 0)),
        ),
        compiler_params=pltpu.CompilerParams(
            dimension_semantics=("parallel",),
            vmem_limit_bytes=32 * 1024 * 1024,
        ),
        cost_estimate=cost,
    )(patches, w_kwkh, b_row)

    return out.reshape(B, num_patches, E)


if __name__ == "__main__":
    # Small shapes consistent with the module (defaults fdim=128, tdim=998,
    # patch=(16,16), embed=768), scaled down.  input_tdim=118 exercises the
    # stride==kernel remainder truncation, and M=42 with tm=16 exercises the
    # cdiv grid's masked partial last block.
    B = 3
    input_fdim, input_tdim = 32, 118
    patch_size = (16, 16)
    embed_dim = 128

    key = jax.random.PRNGKey(0)
    kx, kw_, kb = jax.random.split(key, 3)

    x = jax.random.normal(kx, (B, input_tdim, input_fdim), dtype=jnp.float32)
    conv_weight = (
        jax.random.normal(
            kw_, (embed_dim, 1, patch_size[0], patch_size[1]), dtype=jnp.float32
        )
        * 0.02
    )
    conv_bias = jax.random.normal(kb, (embed_dim,), dtype=jnp.float32) * 0.02

    w_kwkh, b_row = prepare_patch_embed_params(conv_weight, conv_bias)
    out = patch_embed_forward(x, w_kwkh, b_row, patch_size=patch_size)
    out = jax.block_until_ready(out)

    # Pure-f32 reference of the PyTorch math (image transpose + stride=kernel conv).
    ph, pw = patch_size
    Fp = input_fdim // ph
    Tp = input_tdim // pw
    xt = x[:, : Tp * pw, : Fp * ph]                                     # conv remainder drop
    img = jnp.transpose(xt, (0, 2, 1))                                  # (B, F', T')
    p = img.reshape(B, Fp, ph, Tp, pw)
    p = jnp.transpose(p, (0, 1, 3, 2, 4)).reshape(B * Fp * Tp, -1)       # (kh,kw) order
    ref = (p @ conv_weight.reshape(embed_dim, -1).T + conv_bias).reshape(
        B, Fp * Tp, embed_dim
    )

    assert out.shape == (B, Fp * Tp, embed_dim)
    assert out.dtype == jnp.bfloat16
    # bf16 MXU operands + bf16 output with f32 accumulation -> loose tolerance.
    err = float(jnp.max(jnp.abs(out.astype(jnp.float32) - ref)))
    assert jnp.allclose(out.astype(jnp.float32), ref, atol=3e-2, rtol=3e-2), err

    print("KERNEL_OK")
</pallas_src>

<mosaic_0001>
module attributes {stable_mosaic.version = 11 : i64} {
  func.func @_patch_embed_kernel(%arg0: i32, %arg1: memref<16x256xbf16, #tpu.memory_space<vmem>>, %arg2: memref<256x128xbf16, #tpu.memory_space<vmem>>, %arg3: memref<1x128xf32, #tpu.memory_space<vmem>>, %arg4: memref<16x128xbf16, #tpu.memory_space<vmem>>) attributes {dimension_semantics = [#tpu.dimension_semantics<parallel>], iteration_bounds = array<i64: 3>, scalar_prefetch = 0 : i64, scratch_operands = 0 : i64, tpu.core_type = #tpu.core_type<tc>, window_params = [{transform_indices = @transform_0, window_bounds = array<i64: 16, 256>}, {pipeline_mode = #tpu.pipeline_mode<synchronous>, transform_indices = @transform_1, window_bounds = array<i64: 256, 128>}, {pipeline_mode = #tpu.pipeline_mode<synchronous>, transform_indices = @transform_2, window_bounds = array<i64: 1, 128>}, {transform_indices = @transform_3, window_bounds = array<i64: 16, 128>}]} {
    %c0 = arith.constant 0 : index
    %c0_0 = arith.constant 0 : index
    %0 = vector.load %arg1[%c0, %c0_0] : memref<16x256xbf16, #tpu.memory_space<vmem>>, vector<16x256xbf16>
    %c0_1 = arith.constant 0 : index
    %c0_2 = arith.constant 0 : index
    %1 = vector.load %arg2[%c0_1, %c0_2] : memref<256x128xbf16, #tpu.memory_space<vmem>>, vector<256x128xbf16>
    %cst = arith.constant dense<0.000000e+00> : vector<16x128xf32>
    %2 = tpu.matmul %0, %1, %cst {dimension_numbers = #tpu.dot_dimension_numbers<[1], [0], [0], [1], [0, 0, 1, 1], [], []>} : vector<16x256xbf16>, vector<256x128xbf16>, vector<16x128xf32> -> vector<16x128xf32>
    %c0_3 = arith.constant 0 : index
    %c0_4 = arith.constant 0 : index
    %3 = vector.load %arg3[%c0_3, %c0_4] : memref<1x128xf32, #tpu.memory_space<vmem>>, vector<1x128xf32>
    %4 = vector.broadcast %3 : vector<1x128xf32> to vector<16x128xf32>
    %5 = arith.addf %2, %4 : vector<16x128xf32>
    %6 = arith.truncf %5 : vector<16x128xf32> to vector<16x128xbf16>
    %c0_5 = arith.constant 0 : index
    %c0_6 = arith.constant 0 : index
    %7 = vector.load %arg4[%c0_5, %c0_6] : memref<16x128xbf16, #tpu.memory_space<vmem>>, vector<16x128xbf16>
    tpu.vector_store %arg4[%c0_5, %c0_6], %6 {strides = array<i32>} : memref<16x128xbf16, #tpu.memory_space<vmem>>, vector<16x128xbf16>,
    return
  }
  func.func @transform_0(%arg0: i32) -> (i32, i32) {
    %c0_i32 = arith.constant 0 : i32
    %c0_i32_0 = arith.constant 0 : i32
    return %arg0, %c0_i32 : i32, i32
  }
  func.func @transform_1(%arg0: i32) -> (i32, i32) {
    %c0_i32 = arith.constant 0 : i32
    %c0_i32_0 = arith.constant 0 : i32
    %c0_i32_1 = arith.constant 0 : i32
    return %c0_i32, %c0_i32_0 : i32, i32
  }
  func.func @transform_2(%arg0: i32) -> (i32, i32) {
    %c0_i32 = arith.constant 0 : i32
    %c0_i32_0 = arith.constant 0 : i32
    %c0_i32_1 = arith.constant 0 : i32
    return %c0_i32, %c0_i32_0 : i32, i32
  }
  func.func @transform_3(%arg0: i32) -> (i32, i32) {
    %c0_i32 = arith.constant 0 : i32
    %c0_i32_0 = arith.constant 0 : i32
    return %arg0, %c0_i32 : i32, i32
  }
}

</mosaic_0001>

<bundles_post_ra>
// kernel: patch_embed_forward.1
= control target key start
LH: loop header
LB: loop body
LE: loop exit
PB: predicated region body
PF: predicated region fallthrough
CT: control target
= control target key end

     0   :  { %s550_s12 = smov 0   ;;  %s622_s0 = inlined_call_operand.vmem [shape: bf16[42,256], index: 0, kind: input, shape index: {}]   ;;  %s623_s1 = inlined_call_operand.vmem [shape: bf16[256,128], index: 1, kind: input, shape index: {}]   ;;  %s624_s2 = inlined_call_operand.vmem [shape: f32[1,128], index: 2, kind: input, shape index: {}]   ;;  %s625_s3 = inlined_call_operand.vmem [shape: bf16[42,128], index: 3, kind: output, shape index: {}]  }
   0x1 LB: > { %s432_s13 = sadd.s32 4294967295, %s528_s12   ;;  %p436_p0 = scmp.ge.s32.totalorder %s528_s12, 1  ;;  %s528_s12 = sphi %s550_s12, %s13_s12  }
   0x2   : > { %p139_p1 = scmp.lt.s32.totalorder %s528_s12, 4 }
   0x4   : > { %p140_p2 = pnand %p436_p0, %p139_p1 }
   0x5   : > { %v503_v0 = vld [vmem:[%s623_s1 + $0x40] sm:$0xff] (!%p140_p2)   ;;  %s437_s16 = sshll.u32 (!%p140_p2), %s432_s13, 1  ;;  %v505_v2 = vld [vmem:[%s623_s1 + $0x48] sm:$0xff] (!%p140_p2)   ;;  %v507_v4 = vld [vmem:[%s623_s1 + $0x50] sm:$0xff] (!%p140_p2)  }
   0x6   : > { %143 = sbr.rel (%p140_p2) target bundleno = 260 (0x104), region = 32  ;;  %v504_v1 = vld [vmem:[%s623_s1] sm:$0xff] (!%p140_p2)   ;;  %473 = vmatprep.subr.bf16.mxu0 (!%p140_p2), %v503_v0  ;;  %v506_v3 = vld [vmem:[%s623_s1 + $0x8] sm:$0xff] (!%p140_p2)   ;;  %p165_p3 = scmp.lt.s32.totalorder (!%p140_p2), %s437_s16, 5  ;;  %v508_v5 = vld [vmem:[%s623_s1 + $0x10] sm:$0xff] (!%p140_p2)  }
   0x7   : > { %474 = vmatpush3.bf16.msra.mxu0 (!%p140_p2), %v504_v1  ;;  %v509_v6 = vld [vmem:[%s623_s1 + $0x58] sm:$0xff] (!%p140_p2)   ;;  %v511_v8 = vld [vmem:[%s623_s1 + $0x60] sm:$0xff] (!%p140_p2)   ;;  %v513_v10 = vld [vmem:[%s623_s1 + $0x68] sm:$0xff] (!%p140_p2)  }
   0x8   : > { %475 = vmatprep.subr.bf16.mxu0 (!%p140_p2), %v505_v2  ;;  %v510_v7 = vld [vmem:[%s623_s1 + $0x18] sm:$0xff] (!%p140_p2)   ;;  %v512_v9 = vld [vmem:[%s623_s1 + $0x20] sm:$0xff] (!%p140_p2)   ;;  %v514_v12 = vld [vmem:[%s623_s1 + $0x28] sm:$0xff] (!%p140_p2)  }
   0x9   : > { %v515_v13 = vld [vmem:[%s623_s1 + $0x70] sm:$0xff] (!%p140_p2)   ;;  %v517_v15 = vld [vmem:[%s623_s1 + $0x78] sm:$0xff] (!%p140_p2)   ;;  %v442_v22 = vld [vmem:[%s624_s2] ss:$0 sm:$0xff] (!%p140_p2) }
   0xa   : > { %v516_v14 = vld [vmem:[%s623_s1 + $0x30] sm:$0xff] (!%p140_p2)   ;;  %v518_v16 = vld [vmem:[%s623_s1 + $0x38] sm:$0xff] (!%p140_p2)  }
   0xb   : > { %476 = vmatpush3.bf16.msra.mxu0 (!%p140_p2), %v506_v3 }
   0xc   : > { %477 = vmatprep.subr.bf16.mxu0 (!%p140_p2), %v507_v4 }
   0xd   : > { %s627_s16 = smov (!%p165_p3, %s437_s16), 5 }
   0xe   : > { %s465_s4 = sshll.u32 %s627_s16, 3  ;;  %s441_s28 = sshll.u32 %s627_s16, 2 }
   0xf   : > { %478 = vmatpush3.bf16.msra.mxu0 %v508_v5  ;;  %s169_s9 = scalar_lea.vmem %s622_s0, %s465_s4  ;;  %s175_s4 = scalar_lea.vmem %s625_s3, %s441_s28 }
  0x10   : > { %479 = vmatprep.subr.bf16.mxu0 %v509_v6  ;;  %v521_v11 = vld [vmem:[%s169_s9 + $0x4] ss:$8 sps:$4 sm:$0xff]   ;;  %v519_v17 = vld [vmem:[%s169_s9] ss:$8 sps:$4 sm:$0xff]  }
  0x11   : > { %357 = vmatprep.mubr.bf16.mxu0 %v521_v11 }
  0x13   : > { %480 = vmatpush3.bf16.msra.mxu0 %v510_v7 }
  0x14   : > { %481 = vmatprep.subr.bf16.mxu0 %v511_v8 }
  0x17   : > { %482 = vmatpush3.bf16.msra.mxu0 %v512_v9 }
  0x18   : > { %483 = vmatprep.subr.bf16.mxu0 %v513_v10 }
  0x1b   : > { %484 = vmatpush3.bf16.msra.mxu0 %v514_v12 }
  0x1c   : > { %485 = vmatprep.subr.bf16.mxu0 %v515_v13 }
  0x1f   : > { %486 = vmatpush3.bf16.msra.mxu0 %v516_v14 }
  0x20   : > { %487 = vmatprep.subr.bf16.mxu0 %v517_v15 }
  0x23   : > { %488 = vmatpush3.bf16.msra.mxu0 %v518_v16 }
  0x26   : > { %358 = vmatmul.mubr.bf16.vlgmr.msra.gmra.mrb[0].mxu0 %v519_v17 }
  0xf9   : > { %v489_v18 = vpop.f32.mrb[0].mxu0 }
  0xfa   : > { %v490_v19 = vpop.f32.mrb[1].mxu0 }
  0xfb   : > { %v491_v20 = vadd.f32 %v490_v19, %v489_v18  ;;  %v492_v21 = vpop.f32.mrb[2].mxu0 }
  0xfc   : > { %v493_v23 = vpop.f32.mrb[3].mxu0 }
  0xfd   : > { %v494_v24 = vadd.f32 %v493_v23, %v492_v21  ;;  %v360_v25 = vadd.f32 %v491_v20, %v442_v22 }
  0xff   : > { %v363_v26 = vadd.f32 %v494_v24, %v442_v22 }
 0x101   : > { %v471_v27 = vpack.c.bf16 %v363_v26, %v360_v25 }
 0x103   : > { %472 = vst [vmem:[%s175_s4] sm:$0xff] %v471_v27  }
 0x104 PF: > { %s13_s12 = sadd.s32 1, %s528_s12  }
 0x105   : > { %p10_p4 = scmp.ge.s32.totalorder %s13_s12, 5  }
 0x107   :  { %12 = sbr.rel (!%p10_p4) target bundleno = 1 (0x1), region = 62 }

</bundles_post_ra>
